<compile_context>
chip_gen: v6e
topology: v6e:2x2x1
jax: 0.10.0
libtpu: 0.0.40
codegen_flags: <defaults>
</compile_context>

<pallas_src>
import jax
import jax.numpy as jnp
from jax.experimental import pallas as pl
from jax.experimental.pallas import tpu as pltpu


def reward_head_kernel(cls_ref, w1_ref, s1_ref, b1_ref, w2_ref, b2_ref, out_ref):
    # cls_ref: (TB, H) bf16     | w1_ref: (H, H) int8  | s1_ref: (1, H) f32
    # b1_ref:  (1, H) f32       | w2_ref: (1, H) bf16  | b2_ref: (1,) f32 SMEM
    # out_ref: (1, TB) f32 (lane-dense rewards)
    #
    # Linear(H, H): dequantize W1 (int8 -> bf16, exact) on the VPU, matmul on
    # the MXU with f32 accumulation, fold the per-output-channel scale into
    # the f32 epilogue before the bias, Tanh on the EUP.
    w1 = w1_ref[...].astype(jnp.bfloat16)                                 # (H, H)
    acc = jnp.dot(cls_ref[...], w1, preferred_element_type=jnp.float32)   # (TB, H) f32
    h = jnp.tanh(acc * s1_ref[...] + b1_ref[...])                         # (TB, H) f32
    # Dropout(p) in eval mode is the identity -> nothing to do.
    # Linear(H, 1): VPU multiply + XLU lane-reduce with f32 accumulation.
    # Keeps the MXU free of an M=1 matmul (no MRF drain behind the big matmul)
    # and never materializes a transposed (TB, H) copy.
    hb = h.astype(jnp.bfloat16)                                           # (TB, H) bf16
    r = jnp.sum(hb * w2_ref[...], axis=-1, keepdims=True,
                dtype=jnp.float32)                                        # (TB, 1) f32
    # Cheap (TB,1) -> (1,TB) move into the lane-dense output block.
    out_ref[...] = r.T + b2_ref[0]


def _quantize_w1_int8(w1):
    """Per-output-channel symmetric int8 quantization of W1 ([in, out])."""
    w1 = w1.astype(jnp.float32)
    absmax = jnp.maximum(jnp.max(jnp.abs(w1), axis=0, keepdims=True), 1e-8)
    scale = absmax / 127.0                                     # (1, out) f32
    q = jnp.clip(jnp.round(w1 / scale), -127.0, 127.0).astype(jnp.int8)
    return q, scale


def _vmem_limit_bytes(tb, H, w1_buffers):
    """Explicit scoped-VMEM budget from the actual block sizes (+ headroom)."""
    cls_blk = tb * H * 2 * 2            # bf16 cls tile, double-buffered
    w1_blk = H * H * 1 * w1_buffers     # int8 W1 (resident)
    vec_blk = (2 * H * 4 + H * 2) * 2   # s1, b1 (f32) + w2 (bf16), double-buffered
    out_blk = tb * 4 * 2                # (1, TB) f32 output tile, double-buffered
    work = tb * H * (4 + 2)             # f32 h + bf16 temporaries
    limit = int((cls_blk + w1_blk + vec_blk + out_blk + work) * 1.5) + (4 << 20)
    # Floor leaves room for Mosaic-internal scratch; ceiling stays under the
    # smallest physical VMEM across generations (v7x: 64 MiB).
    return max(8 << 20, min(limit, 60 << 20))


def reward_head_pallas(cls_emb, w1, b1, w2, b2, *, tb=None,
                       compute_dtype=jnp.bfloat16):
    """Linear(H,H) -> Tanh -> (Dropout: identity) -> Linear(H,1) via Pallas.

    cls_emb: [B, H], w1: [H, H] ([in, out] layout), b1: [H],
    w2: [1, H] (torch nn.Linear(H,1).weight layout), b2: [1].
    Returns: [B] f32 rewards (squeezed).
    """
    B, H = cls_emb.shape
    if tb is None:
        # v6e/v7x MXUs are 256 wide in M; only worth the larger tile once the
        # batch can fill it.  v5e (128x128 MXU) callers: pass tb=128.
        tb = 256 if B > 128 else 128
    n_tiles = pl.cdiv(B, tb)
    Bp = n_tiles * tb

    if cls_emb.dtype != compute_dtype:
        cls_emb = cls_emb.astype(compute_dtype)
    # Zero-pad the batch; padded rows produce finite garbage that is sliced
    # off below (out[0, :B]) and is never reduced over inside the kernel.
    cls_p = jnp.pad(cls_emb, ((0, Bp - B), (0, 0)))

    # TODO(synk): in production, quantize W1 offline instead of per call.
    w1_q, s1 = _quantize_w1_int8(w1)                    # int8 [H,H], f32 [1,H]
    b1r = b1.reshape(1, H).astype(jnp.float32)
    w2r = w2.reshape(1, H).astype(compute_dtype)
    b2s = b2.reshape(1).astype(jnp.float32)

    # Only shard the batch grid across TensorCores when there are enough tiles
    # for per-core compute to amortize the duplicated resident-W1 DMA (v7x has
    # 2 TCs sharing HBM bandwidth; 2-3 tiles is a net loss).
    dim_sem = ("parallel",) if n_tiles >= 4 else ("arbitrary",)

    # W1's index_map is constant across the grid, so double-buffering it only
    # costs VMEM; drop to a single buffer once it is a significant consumer.
    single_buffer_w1 = (H * H) >= (2 << 20)
    w1_buffers = 1 if single_buffer_w1 else 2
    w1_kwargs = {"pipeline_mode": pl.Buffered(1)} if single_buffer_w1 else {}
    w1_spec = pl.BlockSpec((H, H), lambda i: (0, 0), **w1_kwargs)

    out = pl.pallas_call(
        reward_head_kernel,
        out_shape=jax.ShapeDtypeStruct((1, Bp), jnp.float32),
        grid=(n_tiles,),
        in_specs=[
            pl.BlockSpec((tb, H), lambda i: (i, 0)),      # cls tile (bf16)
            w1_spec,                                      # W1 int8, resident
            pl.BlockSpec((1, H), lambda i: (0, 0)),       # per-channel W1 scale
            pl.BlockSpec((1, H), lambda i: (0, 0)),       # b1
            pl.BlockSpec((1, H), lambda i: (0, 0)),       # W2 row (bf16)
            pl.BlockSpec(memory_space=pltpu.MemorySpace.SMEM),   # b2 scalar
        ],
        out_specs=pl.BlockSpec((1, tb), lambda i: (0, i)),  # lane-dense rewards
        compiler_params=pltpu.CompilerParams(
            dimension_semantics=dim_sem,
            vmem_limit_bytes=_vmem_limit_bytes(tb, H, w1_buffers)),
        # TODO(synk): for very large H (>~4096) add a K grid axis tiling W1 as
        # (tk, H) with an f32 VMEM accumulator; note the threshold is lower on
        # v5e (16 MiB default scoped VMEM) than on v6e.
    )(cls_p, w1_q, s1, b1r, w2r, b2s)
    return out[0, :B]


def reward_model_forward(input_ids, attention_mask, params):
    """RewardModel.forward analogue: backbone CLS embedding -> reward head."""
    del attention_mask  # kept for signature parity; unused by the stub backbone
    # TODO(synk): the pretrained HF transformer backbone has no clean Pallas
    # equivalent; it is replaced by a deterministic embedding lookup.  Only the
    # CLS (position-0) token is gathered (matches last_hidden_state[:, 0])
    # without materializing [B, S, H]; the table is kept in bf16 so the CLS
    # rows flow into the kernel with no extra f32 round-trip.
    cls_embedding = params["embed"][input_ids[:, 0]]              # [B, H] bf16
    return reward_head_pallas(
        cls_embedding, params["w1"], params["b1"], params["w2"], params["b2"]
    )                                                             # [B]


def _reference_forward(input_ids, attention_mask, params):
    cls = params["embed"].astype(jnp.float32)[input_ids[:, 0]]
    h = jnp.tanh(cls @ params["w1"] + params["b1"])
    return jnp.sum(h * params["w2"], axis=-1) + params["b2"][0]


if __name__ == "__main__":
    # Small shapes consistent with the module's forward: batch=2, seq=8,
    # hidden=32 (stands in for hidden_size=768), vocab=64.
    B, S, H, V = 2, 8, 32, 64

    key = jax.random.PRNGKey(0)
    k_emb, k_w1, k_b1, k_w2, k_b2, k_ids = jax.random.split(key, 6)

    params = {
        # bf16 embedding table: gathered CLS rows feed the kernel directly.
        "embed": (jax.random.normal(k_emb, (V, H), dtype=jnp.float32)
                  * 0.02).astype(jnp.bfloat16),
        # Linear(H, H): weight stored as [in, out], bias [H]
        "w1": jax.random.normal(k_w1, (H, H), dtype=jnp.float32) * (1.0 / H**0.5),
        "b1": jax.random.normal(k_b1, (H,), dtype=jnp.float32) * 0.01,
        # Linear(H, 1): weight [1, H] (torch layout), bias [1]
        "w2": jax.random.normal(k_w2, (1, H), dtype=jnp.float32) * (1.0 / H**0.5),
        "b2": jax.random.normal(k_b2, (1,), dtype=jnp.float32) * 0.01,
    }

    input_ids = jax.random.randint(k_ids, (B, S), 0, V, dtype=jnp.int32)
    attention_mask = jnp.ones((B, S), dtype=jnp.int32)

    reward = reward_model_forward(input_ids, attention_mask, params)
    reward = jax.block_until_ready(reward)

    ref = _reference_forward(input_ids, attention_mask, params)
    assert reward.shape == (B,), reward.shape
    # W1 is int8 per-channel quantized and cls/W2 run in bf16 (f32 accumulate):
    # compare at a correspondingly relaxed tolerance.
    assert jnp.allclose(reward, ref, atol=1e-2, rtol=1e-2), (reward, ref)

    print("KERNEL_OK")
</pallas_src>

<mosaic_0001>
module attributes {stable_mosaic.version = 11 : i64} {
  func.func @reward_head_kernel(%arg0: i32, %arg1: memref<128x32xbf16, #tpu.memory_space<vmem>>, %arg2: memref<32x32xi8, #tpu.memory_space<vmem>>, %arg3: memref<1x32xf32, #tpu.memory_space<vmem>>, %arg4: memref<1x32xf32, #tpu.memory_space<vmem>>, %arg5: memref<1x32xbf16, #tpu.memory_space<vmem>>, %arg6: memref<1xf32, #tpu.memory_space<smem>>, %arg7: memref<1x128xf32, #tpu.memory_space<vmem>>) attributes {dimension_semantics = [#tpu.dimension_semantics<arbitrary>], iteration_bounds = array<i64: 1>, scalar_prefetch = 0 : i64, scratch_operands = 0 : i64, tpu.core_type = #tpu.core_type<tc>, window_params = [{transform_indices = @transform_0, window_bounds = array<i64: 128, 32>}, {pipeline_mode = #tpu.pipeline_mode<synchronous>, transform_indices = @transform_1, window_bounds = array<i64: 32, 32>}, {pipeline_mode = #tpu.pipeline_mode<synchronous>, transform_indices = @transform_2, window_bounds = array<i64: 1, 32>}, {pipeline_mode = #tpu.pipeline_mode<synchronous>, transform_indices = @transform_3, window_bounds = array<i64: 1, 32>}, {pipeline_mode = #tpu.pipeline_mode<synchronous>, transform_indices = @transform_4, window_bounds = array<i64: 1, 32>}, {transform_indices = @transform_5, window_bounds = array<i64: 1>}, {transform_indices = @transform_6, window_bounds = array<i64: 1, 128>}]} {
    %c0 = arith.constant 0 : index
    %c0_0 = arith.constant 0 : index
    %0 = vector.load %arg2[%c0, %c0_0] : memref<32x32xi8, #tpu.memory_space<vmem>>, vector<32x32xi8>
    %1 = arith.sitofp %0 : vector<32x32xi8> to vector<32x32xbf16>
    %c0_1 = arith.constant 0 : index
    %c0_2 = arith.constant 0 : index
    %2 = vector.load %arg1[%c0_1, %c0_2] : memref<128x32xbf16, #tpu.memory_space<vmem>>, vector<128x32xbf16>
    %cst = arith.constant dense<0.000000e+00> : vector<128x32xf32>
    %3 = tpu.matmul %2, %1, %cst {dimension_numbers = #tpu.dot_dimension_numbers<[1], [0], [0], [1], [0, 0, 1, 1], [], []>} : vector<128x32xbf16>, vector<32x32xbf16>, vector<128x32xf32> -> vector<128x32xf32>
    %c0_3 = arith.constant 0 : index
    %c0_4 = arith.constant 0 : index
    %4 = vector.load %arg3[%c0_3, %c0_4] : memref<1x32xf32, #tpu.memory_space<vmem>>, vector<1x32xf32>
    %5 = vector.broadcast %4 : vector<1x32xf32> to vector<128x32xf32>
    %6 = arith.mulf %3, %5 : vector<128x32xf32>
    %c0_5 = arith.constant 0 : index
    %c0_6 = arith.constant 0 : index
    %7 = vector.load %arg4[%c0_5, %c0_6] : memref<1x32xf32, #tpu.memory_space<vmem>>, vector<1x32xf32>
    %8 = vector.broadcast %7 : vector<1x32xf32> to vector<128x32xf32>
    %9 = arith.addf %6, %8 : vector<128x32xf32>
    %10 = math.tanh %9 : vector<128x32xf32>
    %11 = arith.truncf %10 : vector<128x32xf32> to vector<128x32xbf16>
    %c0_7 = arith.constant 0 : index
    %c0_8 = arith.constant 0 : index
    %12 = vector.load %arg5[%c0_7, %c0_8] : memref<1x32xbf16, #tpu.memory_space<vmem>>, vector<1x32xbf16>
    %13 = vector.broadcast %12 : vector<1x32xbf16> to vector<128x32xbf16>
    %14 = arith.mulf %11, %13 : vector<128x32xbf16>
    %15 = arith.extf %14 : vector<128x32xbf16> to vector<128x32xf32>
    %cst_9 = arith.constant dense<0.000000e+00> : vector<128xf32>
    %16 = vector.multi_reduction <add>, %15, %cst_9 [1] : vector<128x32xf32> to vector<128xf32>
    %17 = vector.shape_cast %16 : vector<128xf32> to vector<128x1xf32>
    %18 = tpu.transpose %17, [1, 0] : vector<128x1xf32> -> vector<1x128xf32>
    %c0_10 = arith.constant 0 : index
    %19 = memref.load %arg6[%c0_10] : memref<1xf32, #tpu.memory_space<smem>>
    %20 = vector.broadcast %19 : f32 to vector<1x128xf32>
    %21 = arith.addf %18, %20 : vector<1x128xf32>
    %c0_11 = arith.constant 0 : index
    %c0_12 = arith.constant 0 : index
    %22 = vector.load %arg7[%c0_11, %c0_12] : memref<1x128xf32, #tpu.memory_space<vmem>>, vector<1x128xf32>
    tpu.vector_store %arg7[%c0_11, %c0_12], %21 {strides = array<i32>} : memref<1x128xf32, #tpu.memory_space<vmem>>, vector<1x128xf32>,
    return
  }
  func.func @transform_0(%arg0: i32) -> (i32, i32) {
    %c0_i32 = arith.constant 0 : i32
    %c0_i32_0 = arith.constant 0 : i32
    return %arg0, %c0_i32 : i32, i32
  }
  func.func @transform_1(%arg0: i32) -> (i32, i32) {
    %c0_i32 = arith.constant 0 : i32
    %c0_i32_0 = arith.constant 0 : i32
    %c0_i32_1 = arith.constant 0 : i32
    return %c0_i32, %c0_i32_0 : i32, i32
  }
  func.func @transform_2(%arg0: i32) -> (i32, i32) {
    %c0_i32 = arith.constant 0 : i32
    %c0_i32_0 = arith.constant 0 : i32
    %c0_i32_1 = arith.constant 0 : i32
    return %c0_i32, %c0_i32_0 : i32, i32
  }
  func.func @transform_3(%arg0: i32) -> (i32, i32) {
    %c0_i32 = arith.constant 0 : i32
    %c0_i32_0 = arith.constant 0 : i32
    %c0_i32_1 = arith.constant 0 : i32
    return %c0_i32, %c0_i32_0 : i32, i32
  }
  func.func @transform_4(%arg0: i32) -> (i32, i32) {
    %c0_i32 = arith.constant 0 : i32
    %c0_i32_0 = arith.constant 0 : i32
    %c0_i32_1 = arith.constant 0 : i32
    return %c0_i32, %c0_i32_0 : i32, i32
  }
  func.func @transform_5(%arg0: i32) -> i32 {
    %c0_i32 = arith.constant 0 : i32
    %c0_i32_0 = arith.constant 0 : i32
    return %c0_i32 : i32
  }
  func.func @transform_6(%arg0: i32) -> (i32, i32) {
    %c0_i32 = arith.constant 0 : i32
    %c0_i32_0 = arith.constant 0 : i32
    return %c0_i32, %arg0 : i32, i32
  }
}

</mosaic_0001>

<bundles_post_ra>
// kernel: tpu_custom_call.1
= control target key start
LH: loop header
LB: loop body
LE: loop exit
PB: predicated region body
PF: predicated region fallthrough
CT: control target
= control target key end

     0   :  { %vm85_vm0 = vcmask 261120   ;;  %s652_s0 = inlined_call_operand.vmem [shape: bf16[128,32], index: 0, kind: input, shape index: {}]   ;;  %s653_s1 = inlined_call_operand.vmem [shape: s8[32,32], index: 1, kind: input, shape index: {}]   ;;  %s654_s2 = inlined_call_operand.vmem [shape: f32[1,32], index: 2, kind: input, shape index: {}]   ;;  %s655_s3 = inlined_call_operand.vmem [shape: f32[1,32], index: 3, kind: input, shape index: {}]   ;;  %s656_s4 = inlined_call_operand.vmem [shape: bf16[1,32], index: 4, kind: input, shape index: {}]   ;;  %s657_s5 = inlined_call_operand.<no memory space> [shape: f32[1], index: 5, kind: input, shape index: {}]   ;;  %s658_s6 = inlined_call_operand.hbm [shape: f32[1,128], index: 6, kind: output, shape index: {}]  }
   0x1   :  { %v26_v0 = vld [vmem:[%s653_s1] sm:$0xff]  ;;  %v461_v5 = vld [vmem:[%s652_s0 + $0x8] sm:$0xff]   ;;  %v462_v6 = vld [vmem:[%s652_s0 + $0x10] sm:$0xff]  }
   0x2   :  { %v28_v1 = vunpack.c.h.s8.bf16 %v26_v0  ;;  %v27_v2 = vunpack.c.l.s8.bf16 %v26_v0  ;;  %v460_v3 = vld [vmem:[%s652_s0] sm:$0xff]   ;;  %v465_v7 = vld [vmem:[%s652_s0 + $0x28] sm:$0xff]  }
   0x3   :  { %439 = vmatprep.mubr.msk.bf16.mxu0 %vm85_vm0, %v460_v3  ;;  %v464_v4 = vld [vmem:[%s652_s0 + $0x20] sm:$0xff]  }
   0x4   :  { %435 = vmatprep.subr.bf16.mxu0 %v28_v1  ;;  %455 = vmatprep.subr.bf16.mxu1 %v28_v1 }
   0x5   :  { %436 = vmatpush3.bf16.msra.mxu0 %v28_v1  ;;  %457 = vmatpush3.bf16.msra.mxu1 %v28_v1 }
   0x6   :  { %437 = vmatprep.subr.bf16.mxu0 %v27_v2  ;;  %456 = vmatprep.subr.bf16.mxu1 %v27_v2 }
   0x7   :  { %447 = vmatprep.mubr.msk.bf16.mxu1 %vm85_vm0, %v464_v4 }
   0x9   :  { %438 = vmatpush3.bf16.msra.mxu0 %v27_v2 }
   0xa   :  { %12 = vsyncpa [#allocation4], 0  ;;  %458 = vmatpush3.bf16.msra.mxu1 %v27_v2  ;;  %v466_v8 = vld [vmem:[%s652_s0 + $0x30] sm:$0xff]   ;;  %v463_v9 = vld [vmem:[%s652_s0 + $0x18] sm:$0xff]   ;;  %v281_v31 = vlaneseq  ;;  %s522_s18 = smov [#allocation3]  }
   0xb   :  { %v467_v10 = vld [vmem:[%s652_s0 + $0x38] sm:$0xff]   ;;  %v423_v11 = vld [vmem:[%s654_s2] ss:$0 sm:$0xff]  ;;  %s399_s19 = sshll.u32 %s522_s18, 4  ;;  %s400_s19 = int_to_ptr.vmem [resolvable:$true] %s399_s19 }
   0xc   :  { %440 = vmatmul.mubr.msk.bf16.vlgmr.msra.gmra.mxu0 %vm85_vm0, %v461_v5  ;;  %v599_v14 = vld [vmem:[%s655_s3] ss:$0 sm:$0xff]  ;;  %v282_v47 = vshrl.u32 %v281_v31, 7  ;;  %s500_s20 = scalar_lea.vmem %s400_s19, 16  ;;  %s504_s21 = scalar_lea.vmem %s400_s19, 32 }
   0xd   :  { %443 = vmatprep.mubr.msk.bf16.mxu0 %vm85_vm0, %v462_v6  ;;  %448 = vmatmul.mubr.msk.bf16.vlgmr.msra.gmra.mxu1 %vm85_vm0, %v465_v7  ;;  %v277_v46 = vld [vmem:[%s656_s4] sm:$0x1]  ;;  %p501_p0 = scmp.ne.s32.totalorder %s400_s19, %s500_s20  ;;  %p505_p1 = scmp.lt.s32.totalorder %s400_s19, %s400_s19 }
   0xe   :  { %451 = vmatprep.mubr.msk.bf16.mxu1 %vm85_vm0, %v466_v8  ;;  %v279_v57 = vpack.i.b16 %v277_v46, %v277_v46  ;;  %v283_v60 = vsub.s32 0, %v282_v47  ;;  %p506_p2 = scmp.lt.s32.totalorder %s504_s21, %s500_s20 }
  0x10   :  { %v619_v2 = vrot.slane %v279_v57, %v283_v60  ;;  %p507_p3 = por %p506_p2, %p505_p1 }
  0x12   :  { %p508_p4 = pnand %p507_p3, %p501_p0 }
  0x14   :  { %444 = vmatmul.mubr.msk.bf16.gmra.mxu0 %vm85_vm0, %v463_v9 }
  0x15   :  { %452 = vmatmul.mubr.msk.bf16.gmra.mxu1 %vm85_vm0, %v467_v10 }
  0xcc   :  { %v441_v12 = vpop.f32.mrf.mxu0 }
  0xcd   :  { %v216_v13 = vmul.f32 %v441_v12, %v423_v11  ;;  %v449_v15 = vpop.f32.mrf.mxu1 }
  0xce   :  { %v144_v16 = vpop.f32.mrf.mxu0  ;;  %v224_v37 = vmul.f32 %v449_v15, %v423_v11 }
  0xcf   :  { %v214_v17 = vmul.f32 %v423_v11, %v144_v16  ;;  %v176_v18 = vpop.f32.mrf.mxu1  ;;  %v239_v19 = vadd.f32 %v599_v14, %v216_v13 }
  0xd0   :  { %v442_v20 = vpop.f32.mrf.mxu0  ;;  %v222_v22 = vmul.f32 %v423_v11, %v176_v18  ;;  %v247_v50 = vadd.f32 %v599_v14, %v224_v37 }
  0xd1   :  { %v217_v21 = vmul.f32 %v442_v20, %v423_v11  ;;  %v450_v23 = vpop.f32.mrf.mxu1  ;;  %v237_v24 = vadd.f32 %v599_v14, %v214_v17  ;;  %468 = vtanh.f32 %v239_v19 }
  0xd2   :  { %v147_v25 = vpop.f32.mrf.mxu0  ;;  %v245_v34 = vadd.f32 %v599_v14, %v222_v22  ;;  %v225_v43 = vmul.f32 %v450_v23, %v423_v11 }
  0xd3   :  { %v240_v26 = vadd.f32 %v599_v14, %v217_v21  ;;  %v215_v27 = vmul.f32 %v423_v11, %v147_v25  ;;  %v179_v28 = vpop.f32.mrf.mxu1 }
  0xd4   :  { %v445_v29 = vpop.f32.mrf.mxu0  ;;  %v223_v30 = vmul.f32 %v423_v11, %v179_v28  ;;  %v248_v56 = vadd.f32 %v599_v14, %v225_v43 }
  0xd5   :  { %470 = vtanh.f32 %v240_v26  ;;  %v238_v32 = vadd.f32 %v599_v14, %v215_v27  ;;  %v220_v33 = vmul.f32 %v445_v29, %v423_v11  ;;  %v453_v35 = vpop.f32.mrf.mxu1 }
  0xd6   :  { %472 = vtanh.f32 %v237_v24  ;;  %v160_v36 = vpop.f32.mrf.mxu0  ;;  %v246_v38 = vadd.f32 %v599_v14, %v223_v30  ;;  %v228_v51 = vmul.f32 %v453_v35, %v423_v11 }
  0xd7   :  { %474 = vtanh.f32 %v238_v32  ;;  %v243_v39 = vadd.f32 %v599_v14, %v220_v33  ;;  %v218_v40 = vmul.f32 %v423_v11, %v160_v36  ;;  %v192_v41 = vpop.f32.mrf.mxu1 }
  0xd8   :  { %v446_v42 = vpop.f32.mrf.mxu0  ;;  %476 = vtanh.f32 %v245_v34  ;;  %v226_v54 = vmul.f32 %v423_v11, %v192_v41  ;;  %v251_v62 = vadd.f32 %v599_v14, %v228_v51 }
  0xd9   :  { %v241_v44 = vadd.f32 %v599_v14, %v218_v40  ;;  %v221_v45 = vmul.f32 %v446_v42, %v423_v11  ;;  %v454_v48 = vpop.f32.mrf.mxu1  ;;  %478 = vtanh.f32 %v246_v38 }
  0xda   :  { %v163_v49 = vpop.f32.mrf.mxu0  ;;  %480 = vtanh.f32 %v243_v39  ;;  %v229_v58 = vmul.f32 %v454_v48, %v423_v11  ;;  %v249_v63 = vadd.f32 %v599_v14, %v226_v54 }
  0xdb   :  { %v244_v52 = vadd.f32 %v599_v14, %v221_v45  ;;  %v219_v53 = vmul.f32 %v423_v11, %v163_v49  ;;  %v195_v55 = vpop.f32.mrf.mxu1  ;;  %482 = vtanh.f32 %v241_v44 }
  0xdc   :  { %v227_v61 = vmul.f32 %v423_v11, %v195_v55  ;;  %v252_v0 = vadd.f32 %v599_v14, %v229_v58 }
  0xdd   :  { %484 = vtanh.f32 %v244_v52  ;;  %v242_v59 = vadd.f32 %v599_v14, %v219_v53 }
  0xde   :  { %486 = vtanh.f32 %v247_v50  ;;  %v469_v1 = vpop.eup %468  ;;  %v250_v3 = vadd.f32 %v599_v14, %v227_v61 }
  0xdf   :  { %488 = vtanh.f32 %v242_v59 }
  0xe0   :  { %490 = vtanh.f32 %v248_v56 }
  0xe1   :  { %492 = vtanh.f32 %v251_v62 }
  0xe2   :  { %v471_v4 = vpop.eup %470  ;;  %494 = vtanh.f32 %v249_v63 }
  0xe3   :  { %v473_v5 = vpop.eup %472  ;;  %v270_v6 = vpack.c.bf16 %v471_v4, %v469_v1  ;;  %496 = vtanh.f32 %v252_v0 }
  0xe4   :  { %v475_v7 = vpop.eup %474  ;;  %498 = vtanh.f32 %v250_v3 }
  0xe5   :  { %v286_v8 = vmul.bf16 %v619_v2, %v270_v6  ;;  %v269_v9 = vpack.c.bf16 %v475_v7, %v473_v5  ;;  %v477_v10 = vpop.eup %476 }
  0xe6   :  { %v479_v11 = vpop.eup %478 }
  0xe7   :  { %v295_v12 = vunpack.c.l.bf16 %v286_v8  ;;  %v285_v13 = vmul.bf16 %v619_v2, %v269_v9  ;;  %v481_v15 = vpop.eup %480  ;;  %v296_v18 = vunpack.c.h.bf16 %v286_v8  ;;  %v273_v29 = vpack.c.bf16 %v479_v11, %v477_v10 }
  0xe8   :  { %v483_v16 = vpop.eup %482 }
  0xe9   :  { %v315_v14 = vsel %vm85_vm0, %v295_v12, 0.0  ;;  %v293_v17 = vunpack.c.l.bf16 %v285_v13  ;;  %v294_v22 = vunpack.c.h.bf16 %v285_v13  ;;  %v318_v26 = vsel %vm85_vm0, %v296_v18, 0.0 }
  0xea   :  { %v485_v19 = vpop.eup %484  ;;  %316 = vadd.xlane.f32.xlu1 %v315_v14  ;;  %v289_v39 = vmul.bf16 %v619_v2, %v273_v29 }
  0xeb   :  { %v487_v20 = vpop.eup %486  ;;  %v309_v21 = vsel %vm85_vm0, %v293_v17, 0.0  ;;  %v272_v23 = vpack.c.bf16 %v485_v19, %v481_v15  ;;  %v312_v31 = vsel %vm85_vm0, %v294_v22, 0.0  ;;  %v390_v19 = vstv %s657_s5 }
  0xec   :  { %v489_v24 = vpop.eup %488  ;;  %310 = vadd.xlane.f32.xlu0 %v309_v21  ;;  %v302_v45 = vunpack.c.h.bf16 %v289_v39  ;;  %v301_v46 = vunpack.c.l.bf16 %v289_v39 }
  0xed   :  { %v491_v25 = vpop.eup %490  ;;  %v288_v27 = vmul.bf16 %v619_v2, %v272_v23  ;;  %v271_v28 = vpack.c.bf16 %v489_v24, %v483_v16 }
  0xee   :  { %319 = vadd.xlane.f32.xlu1 %v318_v26  ;;  %v493_v30 = vpop.eup %492  ;;  %v274_v35 = vpack.c.bf16 %v491_v25, %v487_v20  ;;  %v336_v53 = vsel %vm85_vm0, %v302_v45, 0.0  ;;  %v333_v54 = vsel %vm85_vm0, %v301_v46, 0.0 }
  0xef   :  { %v299_v32 = vunpack.c.l.bf16 %v288_v27  ;;  %v287_v33 = vmul.bf16 %v619_v2, %v271_v28  ;;  %v495_v34 = vpop.eup %494  ;;  %v300_v42 = vunpack.c.h.bf16 %v288_v27 }
  0xf0   :  { %313 = vadd.xlane.f32.xlu0 %v312_v31  ;;  %v497_v36 = vpop.eup %496  ;;  %v290_v44 = vmul.bf16 %v619_v2, %v274_v35 }
  0xf1   :  { %v327_v37 = vsel %vm85_vm0, %v299_v32, 0.0  ;;  %v298_v38 = vunpack.c.h.bf16 %v287_v33  ;;  %v499_v40 = vpop.eup %498  ;;  %v297_v43 = vunpack.c.l.bf16 %v287_v33  ;;  %v276_v48 = vpack.c.bf16 %v497_v36, %v493_v30 }
  0xf2   :  { %v275_v47 = vpack.c.bf16 %v499_v40, %v495_v34  ;;  %v330_v49 = vsel %vm85_vm0, %v300_v42, 0.0  ;;  %v304_v51 = vunpack.c.h.bf16 %v290_v44  ;;  %v303_v52 = vunpack.c.l.bf16 %v290_v44 }
  0xf3   :  { %v324_v41 = vsel %vm85_vm0, %v298_v38, 0.0  ;;  %v321_v50 = vsel %vm85_vm0, %v297_v43, 0.0  ;;  %v292_v56 = vmul.bf16 %v619_v2, %v276_v48 }
  0xf4   :  { %328 = vadd.xlane.f32.xlu0 %v327_v37  ;;  %325 = vadd.xlane.f32.xlu1 %v324_v41  ;;  %v291_v55 = vmul.bf16 %v619_v2, %v275_v47  ;;  %v342_v57 = vsel %vm85_vm0, %v304_v51, 0.0  ;;  %v339_v58 = vsel %vm85_vm0, %v303_v52, 0.0 }
  0xf5   :  { %v307_v60 = vunpack.c.l.bf16 %v292_v56  ;;  %v308_v63 = vunpack.c.h.bf16 %v292_v56 }
  0xf6   :  { %v306_v59 = vunpack.c.h.bf16 %v291_v55  ;;  %v305_v0 = vunpack.c.l.bf16 %v291_v55 }
  0xf7   :  { %v351_v62 = vsel %vm85_vm0, %v307_v60, 0.0  ;;  %v354_v1 = vsel %vm85_vm0, %v308_v63, 0.0 }
  0xf8   :  { %331 = vadd.xlane.f32.xlu1 %v330_v49  ;;  %322 = vadd.xlane.f32.xlu0 %v321_v50  ;;  %v348_v61 = vsel %vm85_vm0, %v306_v59, 0.0  ;;  %v345_v2 = vsel %vm85_vm0, %v305_v0, 0.0 }
  0xfc   :  { %337 = vadd.xlane.f32.xlu1 %v336_v53  ;;  %334 = vadd.xlane.f32.xlu0 %v333_v54 }
 0x100   :  { %343 = vadd.xlane.f32.xlu1 %v342_v57  ;;  %340 = vadd.xlane.f32.xlu0 %v339_v58 }
 0x104   :  { %349 = vadd.xlane.f32.xlu1 %v348_v61  ;;  %352 = vadd.xlane.f32.xlu0 %v351_v62 }
 0x108   :  { %355 = vadd.xlane.f32.xlu1 %v354_v1  ;;  %346 = vadd.xlane.f32.xlu0 %v345_v2 }
 0x173   :  { %v317_v5 = vpop.xlane.xlu1 %316 }
 0x175   :  { %v311_v3 = vpop.xlane.xlu0 %310 }
 0x176   :  { %357 = vxpose.xlu0.b32.start [1/16] (narrow) %v311_v3, 8 }
 0x177   :  { %v320_v7 = vpop.xlane.xlu1 %319 }
 0x179   :  { %v314_v4 = vpop.xlane.xlu0 %313 }
 0x17a   :  { %358 = vxpose.xlu0.b32.cont [2/16] (narrow) %v314_v4, 8 }
 0x17d   :  { %v329_v6 = vpop.xlane.xlu0 %328  ;;  %v326_v9 = vpop.xlane.xlu1 %325 }
 0x17e   :  { %359 = vxpose.xlu0.b32.cont [3/16] (narrow) %v317_v5, 8 }
 0x181   :  { %v323_v8 = vpop.xlane.xlu0 %322  ;;  %v332_v10 = vpop.xlane.xlu1 %331 }
 0x182   :  { %360 = vxpose.xlu0.b32.cont [4/16] (narrow) %v320_v7, 8 }
 0x185   :  { %v335_v11 = vpop.xlane.xlu0 %334  ;;  %v338_v12 = vpop.xlane.xlu1 %337 }
 0x186   :  { %361 = vxpose.xlu0.b32.cont [5/16] (narrow) %v323_v8, 8 }
 0x189   :  { %v341_v13 = vpop.xlane.xlu0 %340  ;;  %v344_v16 = vpop.xlane.xlu1 %343 }
 0x18a   :  { %362 = vxpose.xlu0.b32.cont [6/16] (narrow) %v326_v9, 8 }
 0x18d   :  { %v353_v15 = vpop.xlane.xlu0 %352  ;;  %v350_v17 = vpop.xlane.xlu1 %349 }
 0x18e   :  { %363 = vxpose.xlu0.b32.cont [7/16] (narrow) %v329_v6, 8 }
 0x191   :  { %v347_v14 = vpop.xlane.xlu0 %346  ;;  %v356_v18 = vpop.xlane.xlu1 %355 }
 0x192   :  { %364 = vxpose.xlu0.b32.cont [8/16] (narrow) %v332_v10, 8 }
 0x196   :  { %365 = vxpose.xlu0.b32.cont [9/16] (narrow) %v335_v11, 8 }
 0x19a   :  { %366 = vxpose.xlu0.b32.cont [10/16] (narrow) %v338_v12, 8 }
 0x19e   :  { %367 = vxpose.xlu0.b32.cont [11/16] (narrow) %v341_v13, 8 }
 0x1a2   :  { %368 = vxpose.xlu0.b32.cont [12/16] (narrow) %v344_v16, 8 }
 0x1a6   :  { %369 = vxpose.xlu0.b32.cont [13/16] (narrow) %v347_v14, 8 }
 0x1aa   :  { %370 = vxpose.xlu0.b32.cont [14/16] (narrow) %v350_v17, 8 }
 0x1ae   :  { %371 = vxpose.xlu0.b32.cont [15/16] (narrow) %v353_v15, 8 }
 0x1b2   :  { %372 = vxpose.xlu0.b32.end [16/16] (narrow) %v356_v18, 8 }
 0x1f2   :  { %v373_v20 = vpop.trf.xlu0 }
 0x1f3   :  { %v391_v21 = vadd.f32 %v390_v19, %v373_v20 }
 0x1f5   :  { %392 = vst [vmem:[#allocation3] sm:$0x1] %v391_v21 }
 0x1f6   :  { %511 = shalt.err (!%p508_p4)
}
 0x1f7   :  { %402 = dma.vmem_to_hbm [thread:$0]  %s400_s19, 16, %s658_s6, [#allocation4]  }
 0x1f8   :  { %520 = dma.done.wait [#allocation4], 16  }
 0x1f9   :  { %521 = vsyncadd [#allocation4], 4294967280 }
 0x1fa   :  { %406 = vsyncpa [#allocation4], 1 }

</bundles_post_ra>
